<compile_context>
chip_gen: v7x
topology: tpu7x:2x2x1
jax: 0.10.0
libtpu: 0.0.40
codegen_flags: <defaults>
</compile_context>

<pallas_src>
import functools

import jax
import jax.numpy as jnp
from jax.experimental import pallas as pl
from jax.experimental.pallas import tpu as pltpu


# ----------------------------------------------------------------------------
# generation-aware VMEM budget and tile caps
# ----------------------------------------------------------------------------

def _vmem_budget():
    try:
        cap = pltpu.get_tpu_info().vmem_capacity_bytes
    except Exception:
        cap = None
    if cap is None:
        return 48 * 1024 * 1024, False          # conservative fallback
    if cap <= 80 * 1024 * 1024:                 # v7x: 64 MiB physical per TC
        return 44 * 1024 * 1024, False
    return 100 * 1024 * 1024, True              # v5e / v6e: 128 MiB physical


_VMEM_LIMIT, _BIG_VMEM = _vmem_budget()
_TM_CAP = 512 if _BIG_VMEM else 256
_TN_CAP = 1024 if _BIG_VMEM else 512
_TK_CAP = 512


# ----------------------------------------------------------------------------
# small helpers (padding / tile selection)
# ----------------------------------------------------------------------------

def _round_up(x, m):
    return (x + m - 1) // m * m


def _pick_tile(dim, base, max_tile):
    """Return (tile, padded_dim) with tile | padded_dim and tile % base == 0."""
    p = _round_up(dim, base)
    if p <= max_tile:
        return p, p
    return max_tile, _round_up(p, max_tile)


def _pad2(a, rows, cols):
    r, c = a.shape
    if r == rows and c == cols:
        return a
    return jnp.pad(a, ((0, rows - r), (0, cols - c)))


# ----------------------------------------------------------------------------
# Fused RMSNorm + matmul (QKV / gate-up / lm_head), cached prologue, optional
# fused RoPE epilogue (applied lane-dense to the q|k output columns only).
# ----------------------------------------------------------------------------

def _rmsnorm_matmul_kernel(*refs, eps, true_k, rope, head_dim, rope_cols, tn):
    if rope:
        x_ref, g_ref, w_ref, cos_ref, sin_ref, o_ref, xn_ref = refs
    else:
        x_ref, g_ref, w_ref, o_ref, xn_ref = refs
    j = pl.program_id(1)

    # RMSNorm prologue: computed once per row tile (j == 0), cached in bf16 scratch
    # and reused for all output-N tiles of this row tile.
    @pl.when(j == 0)
    def _():
        x = x_ref[...].astype(jnp.float32)
        # padded columns are zero -> divide by the true hidden size
        var = jnp.sum(x * x, axis=-1, keepdims=True) * (1.0 / true_k)
        xn_ref[...] = (x * jax.lax.rsqrt(var + eps) * g_ref[...]).astype(jnp.bfloat16)

    y = jnp.dot(xn_ref[...], w_ref[...], preferred_element_type=jnp.float32)

    if rope:
        # Lane-dense RoPE over the whole (tm, tn) tile:
        #   rotate_half(x)[c] = -x[c + D/2] if (c mod D) <  D/2
        #                        x[c - D/2] if (c mod D) >= D/2
        # implemented with two circular rolls + a select (no per-head slicing).
        D = head_dim
        half = D // 2
        cos = jnp.tile(cos_ref[...], (1, tn // D))
        sin = jnp.tile(sin_ref[...], (1, tn // D))
        col = j * tn + jax.lax.broadcasted_iota(jnp.int32, (1, tn), 1)
        lower = (col % D) < half
        rot = jnp.where(lower,
                        -pltpu.roll(y, tn - half, 1),   # picks y[c + D/2]
                        pltpu.roll(y, half, 1))         # picks y[c - D/2]
        y = jnp.where(col < rope_cols, y * cos + rot * sin, y)

    o_ref[...] = y.astype(o_ref.dtype)


def rmsnorm_matmul(x, gain, w_t, *, eps=1e-6, out_dtype=jnp.float32,
                   rope_cos=None, rope_sin=None, head_dim=0, rope_cols=0):
    """y = maybe_rope(rmsnorm(x, gain) @ w_t); x:[M,K] f32, gain:[K], w_t:[K,N] bf16."""
    M, K = x.shape
    K2, N = w_t.shape
    assert K == K2
    rope = rope_cos is not None
    tm, Mp = _pick_tile(M, 8, _TM_CAP)
    Kp = _round_up(K, 128)
    tn, Np = _pick_tile(N, 128, _TN_CAP)
    if rope:
        assert tn % head_dim == 0 and rope_cols % head_dim == 0

    xp = _pad2(x, Mp, Kp)
    gp = _pad2(gain.reshape(1, K).astype(jnp.float32), 1, Kp)
    wp = _pad2(w_t, Kp, Np).astype(jnp.bfloat16)

    in_specs = [pl.BlockSpec((tm, Kp), lambda i, j: (i, 0)),
                pl.BlockSpec((1, Kp), lambda i, j: (0, 0)),
                pl.BlockSpec((Kp, tn), lambda i, j: (0, j))]
    args = [xp, gp, wp]
    if rope:
        cp = _pad2(rope_cos.astype(jnp.float32), Mp, head_dim)
        sp = _pad2(rope_sin.astype(jnp.float32), Mp, head_dim)
        in_specs += [pl.BlockSpec((tm, head_dim), lambda i, j: (i, 0)),
                     pl.BlockSpec((tm, head_dim), lambda i, j: (i, 0))]
        args += [cp, sp]

    kern = functools.partial(_rmsnorm_matmul_kernel, eps=eps, true_k=K, rope=rope,
                             head_dim=head_dim, rope_cols=rope_cols, tn=tn)
    out = pl.pallas_call(
        kern,
        out_shape=jax.ShapeDtypeStruct((Mp, Np), out_dtype),
        grid_spec=pltpu.PrefetchScalarGridSpec(
            num_scalar_prefetch=0, grid=(Mp // tm, Np // tn),
            in_specs=in_specs,
            out_specs=pl.BlockSpec((tm, tn), lambda i, j: (i, j)),
            scratch_shapes=[pltpu.VMEM((tm, Kp), jnp.bfloat16)]),
        compiler_params=pltpu.CompilerParams(
            # j must be sequential so the cached prologue (j == 0) is valid
            dimension_semantics=("parallel", "arbitrary"),
            vmem_limit_bytes=_VMEM_LIMIT),
    )(*args)
    return out[:M, :N] if (Mp, Np) != (M, N) else out


# ----------------------------------------------------------------------------
# Matmul with fused residual add (wo projection)
# ----------------------------------------------------------------------------

def _matmul_res_kernel(x_ref, w_ref, r_ref, o_ref, acc_ref):
    @pl.when(pl.program_id(2) == 0)
    def _():
        acc_ref[...] = jnp.zeros_like(acc_ref)

    acc_ref[...] += jnp.dot(x_ref[...].astype(jnp.bfloat16), w_ref[...],
                            preferred_element_type=jnp.float32)

    @pl.when(pl.program_id(2) == pl.num_programs(2) - 1)
    def _():
        o_ref[...] = (acc_ref[...] + r_ref[...].astype(jnp.float32)
                      ).astype(o_ref.dtype)


def matmul_residual(x, w_t, res):
    """y = x @ w_t + res ; x:[M,K] (bf16 ok), w_t:[K,N] bf16, res:[M,N] f32."""
    M, K = x.shape
    K2, N = w_t.shape
    assert K == K2 and res.shape == (M, N)
    tm, Mp = _pick_tile(M, 8, _TM_CAP)
    tk, Kp = _pick_tile(K, 128, _TK_CAP)
    tn, Np = _pick_tile(N, 128, _TN_CAP)

    xp = _pad2(x, Mp, Kp)
    wp = _pad2(w_t, Kp, Np).astype(jnp.bfloat16)
    rp = _pad2(res, Mp, Np)

    out = pl.pallas_call(
        _matmul_res_kernel,
        out_shape=jax.ShapeDtypeStruct((Mp, Np), jnp.float32),
        grid_spec=pltpu.PrefetchScalarGridSpec(
            num_scalar_prefetch=0, grid=(Mp // tm, Np // tn, Kp // tk),
            in_specs=[pl.BlockSpec((tm, tk), lambda i, j, k: (i, k)),
                      pl.BlockSpec((tk, tn), lambda i, j, k: (k, j)),
                      pl.BlockSpec((tm, tn), lambda i, j, k: (i, j))],
            out_specs=pl.BlockSpec((tm, tn), lambda i, j, k: (i, j)),
            scratch_shapes=[pltpu.VMEM((tm, tn), jnp.float32)]),
        compiler_params=pltpu.CompilerParams(
            dimension_semantics=("parallel", "parallel", "arbitrary"),
            vmem_limit_bytes=_VMEM_LIMIT),
    )(xp, wp, rp)
    return out[:M, :N] if (Mp, Np) != (M, N) else out


# ----------------------------------------------------------------------------
# Fused SiLU(gate)*up + down projection + residual (gate/up streamed in bf16)
# ----------------------------------------------------------------------------

def _silu_matmul_res_kernel(g_ref, u_ref, w_ref, r_ref, o_ref, acc_ref):
    @pl.when(pl.program_id(2) == 0)
    def _():
        acc_ref[...] = jnp.zeros_like(acc_ref)

    g = g_ref[...].astype(jnp.float32)
    u = u_ref[...].astype(jnp.float32)
    p = (g * jax.nn.sigmoid(g) * u).astype(jnp.bfloat16)
    acc_ref[...] += jnp.dot(p, w_ref[...], preferred_element_type=jnp.float32)

    @pl.when(pl.program_id(2) == pl.num_programs(2) - 1)
    def _():
        o_ref[...] = (acc_ref[...] + r_ref[...].astype(jnp.float32)
                      ).astype(o_ref.dtype)


def silu_mul_matmul_residual(gate_up, wd_t, res, intermediate):
    """y = (silu(g)*u) @ wd_t + res ; gate_up=[M,2I] bf16 (g|u), wd_t:[I,N] bf16."""
    M, two_i = gate_up.shape
    I = intermediate
    assert two_i == 2 * I and I % 128 == 0
    Ik, N = wd_t.shape
    assert Ik == I and res.shape == (M, N)

    tm, Mp = _pick_tile(M, 8, _TM_CAP)
    tk = next(c for c in (512, 256, 128) if I % c == 0)   # tk must divide I exactly
    n_i = I // tk
    tn, Np = _pick_tile(N, 128, _TN_CAP)

    gup = _pad2(gate_up, Mp, 2 * I)
    wp = _pad2(wd_t, I, Np).astype(jnp.bfloat16)
    rp = _pad2(res, Mp, Np)

    out = pl.pallas_call(
        _silu_matmul_res_kernel,
        out_shape=jax.ShapeDtypeStruct((Mp, Np), jnp.float32),
        grid_spec=pltpu.PrefetchScalarGridSpec(
            num_scalar_prefetch=0, grid=(Mp // tm, Np // tn, n_i),
            in_specs=[pl.BlockSpec((tm, tk), lambda i, j, k: (i, k)),         # gate
                      pl.BlockSpec((tm, tk), lambda i, j, k: (i, k + n_i)),   # up
                      pl.BlockSpec((tk, tn), lambda i, j, k: (k, j)),
                      pl.BlockSpec((tm, tn), lambda i, j, k: (i, j))],
            out_specs=pl.BlockSpec((tm, tn), lambda i, j, k: (i, j)),
            scratch_shapes=[pltpu.VMEM((tm, tn), jnp.float32)]),
        compiler_params=pltpu.CompilerParams(
            dimension_semantics=("parallel", "parallel", "arbitrary"),
            vmem_limit_bytes=_VMEM_LIMIT),
    )(gup, gup, wp, rp)
    return out[:M, :N] if (Mp, Np) != (M, N) else out


# ----------------------------------------------------------------------------
# Flash-style causal attention: lower-triangular (qi, ki) schedule via scalar
# prefetch (no above-diagonal KV DMAs), batched-head einsum, bf16 IO.
# ----------------------------------------------------------------------------

def _flash_attn_kernel(qi_tab, ki_tab, q_ref, k_ref, v_ref, o_ref,
                       m_sc, l_sc, acc_sc, *, scale, tq, tkv, hp, head_dim):
    t = pl.program_id(2)
    qi = qi_tab[t]
    ki = ki_tab[t]

    @pl.when(ki == 0)
    def _():
        m_sc[...] = jnp.full_like(m_sc, -1e30)
        l_sc[...] = jnp.zeros_like(l_sc)
        acc_sc[...] = jnp.zeros_like(acc_sc)

    # Gather the packed heads of this group into (hp, tile, D) once per step.
    q = jnp.stack([q_ref[0, :, h * head_dim:(h + 1) * head_dim]
                   for h in range(hp)], 0)                  # (hp, tq,  D) bf16
    k = jnp.stack([k_ref[0, :, h * head_dim:(h + 1) * head_dim]
                   for h in range(hp)], 0)                  # (hp, tkv, D) bf16
    v = jnp.stack([v_ref[0, :, h * head_dim:(h + 1) * head_dim]
                   for h in range(hp)], 0)                  # (hp, tkv, D) bf16

    s = jnp.einsum("hqd,hkd->hqk", q, k,
                   preferred_element_type=jnp.float32) * scale
    row = qi * tq + jax.lax.broadcasted_iota(jnp.int32, (1, tq, tkv), 1)
    col = ki * tkv + jax.lax.broadcasted_iota(jnp.int32, (1, tq, tkv), 2)
    s = jnp.where(col <= row, s, -1e30)          # finite fill (also masks seq padding)

    m_prev = m_sc[...]                                       # (hp, tq, 1)
    m_new = jnp.maximum(m_prev, jnp.max(s, axis=-1, keepdims=True))
    alpha = jnp.exp(m_prev - m_new)
    p = jnp.exp(s - m_new)
    l_sc[...] = alpha * l_sc[...] + jnp.sum(p, axis=-1, keepdims=True)
    acc_sc[...] = alpha * acc_sc[...] + jnp.einsum(
        "hqk,hkd->hqd", p.astype(jnp.bfloat16), v,
        preferred_element_type=jnp.float32)
    m_sc[...] = m_new

    # The diagonal block is the last kv block of this q block: finalize + store once.
    @pl.when(ki == qi)
    def _():
        inv = pl.reciprocal(l_sc[...], approx=True)          # EUP slot, ~free
        out = acc_sc[...] * inv                              # (hp, tq, D)
        o_ref[0] = jnp.concatenate([out[h] for h in range(hp)],
                                   axis=-1).astype(o_ref.dtype)


def flash_attention(qkv, *, batch, seq, n_heads, head_dim):
    """qkv: [batch*seq, 3H] bf16 (RoPE already applied to q|k) -> [batch*seq, H] bf16."""
    H = n_heads * head_dim
    hp = min(n_heads, max(1, 128 // head_dim))
    while n_heads % hp:
        hp -= 1
    blk_h = hp * head_dim
    assert blk_h % 128 == 0, "head_dim must pack heads into 128-lane groups"
    G = n_heads // hp

    Sp = _round_up(seq, 8) if seq <= 128 else _round_up(seq, 128)
    # TODO(synk): bump to 256 on v6e when S allows (chip detection kept coarse here).
    tq = tkv = min(128, Sp)

    qkv3 = qkv.reshape(batch, seq, 3 * H)
    if Sp != seq:
        qkv3 = jnp.pad(qkv3, ((0, 0), (0, Sp - seq), (0, 0)))

    # Flattened lower-triangular (qi, ki) schedule: only causally-needed KV blocks
    # are ever DMA'd (scalar-prefetch tables drive the index_maps).
    nq = Sp // tq
    qi_tab = jnp.array([qi for qi in range(nq) for _ in range(qi + 1)], jnp.int32)
    ki_tab = jnp.array([ki for qi in range(nq) for ki in range(qi + 1)], jnp.int32)
    T = int(qi_tab.shape[0])

    kern = functools.partial(_flash_attn_kernel, scale=1.0 / (head_dim ** 0.5),
                             tq=tq, tkv=tkv, hp=hp, head_dim=head_dim)
    out = pl.pallas_call(
        kern,
        out_shape=jax.ShapeDtypeStruct((batch, Sp, H), jnp.bfloat16),
        grid_spec=pltpu.PrefetchScalarGridSpec(
            num_scalar_prefetch=2, grid=(batch, G, T),
            in_specs=[
                pl.BlockSpec((1, tq, blk_h),
                             lambda b, hg, t, qt, kt: (b, qt[t], hg)),
                pl.BlockSpec((1, tkv, blk_h),
                             lambda b, hg, t, qt, kt: (b, kt[t], hg + G)),
                pl.BlockSpec((1, tkv, blk_h),
                             lambda b, hg, t, qt, kt: (b, kt[t], hg + 2 * G)),
            ],
            out_specs=pl.BlockSpec((1, tq, blk_h),
                                   lambda b, hg, t, qt, kt: (b, qt[t], hg)),
            scratch_shapes=[pltpu.VMEM((hp, tq, 1), jnp.float32),
                            pltpu.VMEM((hp, tq, 1), jnp.float32),
                            pltpu.VMEM((hp, tq, head_dim), jnp.float32)]),
        compiler_params=pltpu.CompilerParams(
            dimension_semantics=("parallel", "parallel", "arbitrary"),
            vmem_limit_bytes=_VMEM_LIMIT),
    )(qi_tab, ki_tab, qkv3, qkv3, qkv3)
    if Sp != seq:
        out = out[:, :seq, :]
    return out.reshape(batch * seq, H)


# ----------------------------------------------------------------------------
# SmoothQuant preprocessing kernels (stat_tensor + smooth_ln_fcs), all tiled
# ----------------------------------------------------------------------------

def _rmsnorm_absmax_kernel(x_ref, g_ref, o_ref, *, eps, true_h):
    x = x_ref[...].astype(jnp.float32)
    var = jnp.sum(x * x, axis=-1, keepdims=True) * (1.0 / true_h)
    a = jnp.abs(x * jax.lax.rsqrt(var + eps) * g_ref[...])
    blk = jnp.max(a, axis=0, keepdims=True)

    @pl.when(pl.program_id(0) == 0)
    def _():
        o_ref[...] = blk

    @pl.when(pl.program_id(0) != 0)
    def _():
        o_ref[...] = jnp.maximum(o_ref[...], blk)


def rmsnorm_absmax(x, gain, eps=1e-6):
    """stat_tensor: per-channel abs-max of rmsnorm(x, gain), tiled over tokens."""
    M, H = x.shape
    Mp = _round_up(M, 8)
    tb = min(256, Mp)
    Mp = _round_up(Mp, tb)
    xp = _pad2(x, Mp, H)               # zero rows never raise the abs-max
    return pl.pallas_call(
        functools.partial(_rmsnorm_absmax_kernel, eps=eps, true_h=H),
        out_shape=jax.ShapeDtypeStruct((1, H), jnp.float32),
        grid_spec=pltpu.PrefetchScalarGridSpec(
            num_scalar_prefetch=0, grid=(Mp // tb,),
            in_specs=[pl.BlockSpec((tb, H), lambda i: (i, 0)),
                      pl.BlockSpec((1, H), lambda i: (0, 0))],
            out_specs=pl.BlockSpec((1, H), lambda i: (0, 0))),
        compiler_params=pltpu.CompilerParams(
            dimension_semantics=("arbitrary",), vmem_limit_bytes=_VMEM_LIMIT),
    )(xp, gain.reshape(1, H).astype(jnp.float32))


def _w_absmax_kernel(w_ref, o_ref):
    blk = jnp.max(jnp.abs(w_ref[...].astype(jnp.float32)), axis=0, keepdims=True)

    @pl.when(pl.program_id(0) == 0)
    def _():
        o_ref[...] = blk

    @pl.when(pl.program_id(0) != 0)
    def _():
        o_ref[...] = jnp.maximum(o_ref[...], blk)


def _smooth_apply_kernel(ln_ref, act_ref, wmax_ref, w_ref, ln_o_ref, w_o_ref):
    # smooth_ln_fcs with alpha = 0.5 (module default): pow(0.5) == sqrt.
    wmax = jnp.maximum(wmax_ref[...], 1e-5)
    scales = jnp.maximum(jnp.sqrt(act_ref[...]) / jnp.sqrt(wmax), 1e-5)

    @pl.when(pl.program_id(0) == 0)
    def _():
        ln_o_ref[...] = ln_ref[...] / scales

    w_o_ref[...] = w_ref[...] * scales


def smooth_ln_fcs(ln_w, fc_weights, act_scales):
    """ln_w: [H]; fc_weights: list of [out_i, H]; act_scales: [1, H]."""
    H = ln_w.shape[0]
    splits = [w.shape[0] for w in fc_weights]
    w_cat = jnp.concatenate(fc_weights, axis=0).astype(jnp.float32)   # [F, H]
    F = w_cat.shape[0]
    Fp = _round_up(F, 8)
    tf = min(256, Fp)
    Fp = _round_up(Fp, tf)
    w_pad = _pad2(w_cat, Fp, H)

    # pass 1: per-channel weight abs-max (running max over F tiles)
    wmax = pl.pallas_call(
        _w_absmax_kernel,
        out_shape=jax.ShapeDtypeStruct((1, H), jnp.float32),
        grid_spec=pltpu.PrefetchScalarGridSpec(
            num_scalar_prefetch=0, grid=(Fp // tf,),
            in_specs=[pl.BlockSpec((tf, H), lambda i: (i, 0))],
            out_specs=pl.BlockSpec((1, H), lambda i: (0, 0))),
        compiler_params=pltpu.CompilerParams(
            dimension_semantics=("arbitrary",), vmem_limit_bytes=_VMEM_LIMIT),
    )(w_pad)

    # pass 2: compute scales once, rescale ln and all fc weights (tiled over F)
    ln_new, w_new = pl.pallas_call(
        _smooth_apply_kernel,
        out_shape=(jax.ShapeDtypeStruct((1, H), jnp.float32),
                   jax.ShapeDtypeStruct((Fp, H), jnp.float32)),
        grid_spec=pltpu.PrefetchScalarGridSpec(
            num_scalar_prefetch=0, grid=(Fp // tf,),
            in_specs=[pl.BlockSpec((1, H), lambda i: (0, 0)),
                      pl.BlockSpec((1, H), lambda i: (0, 0)),
                      pl.BlockSpec((1, H), lambda i: (0, 0)),
                      pl.BlockSpec((tf, H), lambda i: (i, 0))],
            out_specs=[pl.BlockSpec((1, H), lambda i: (0, 0)),
                       pl.BlockSpec((tf, H), lambda i: (i, 0))]),
        compiler_params=pltpu.CompilerParams(
            dimension_semantics=("arbitrary",), vmem_limit_bytes=_VMEM_LIMIT),
    )(ln_w.reshape(1, H).astype(jnp.float32), act_scales, wmax, w_pad)

    outs, off = [], 0
    for n in splits:
        outs.append(w_new[off:off + n])
        off += n
    return ln_new.reshape(H), outs


# ----------------------------------------------------------------------------
# Glue: rotary tables, params, smoothing + runtime weight prep, full forward
# ----------------------------------------------------------------------------

def rope_tables(S, D, base=10000.0):
    inv_freq = 1.0 / (base ** (jnp.arange(0, D, 2, dtype=jnp.float32) / D))
    t = jnp.arange(S, dtype=jnp.float32)
    freqs = jnp.outer(t, inv_freq)                             # [S, D/2]
    emb = jnp.concatenate([freqs, freqs], axis=-1)             # [S, D]
    return jnp.cos(emb), jnp.sin(emb)


def init_params(key, V, H, Hn, D, I):
    ks = jax.random.split(key, 10)
    n = lambda k, shape: (0.02 * jax.random.normal(k, shape)).astype(jnp.float32)
    return {
        "embed": n(ks[0], (V, H)),
        "ln1": jnp.ones((H,), jnp.float32),
        "wq": n(ks[1], (H, H)), "wk": n(ks[2], (H, H)), "wv": n(ks[3], (H, H)),
        "wo": n(ks[4], (H, H)),
        "ln2": jnp.ones((H,), jnp.float32),
        "wg": n(ks[5], (I, H)), "wu": n(ks[6], (I, H)), "wd": n(ks[7], (H, I)),
        "lnf": jnp.ones((H,), jnp.float32),
        "lm_head": n(ks[8], (V, H)),
    }


def smooth_model(params, input_ids):
    """get_act_scales (stat_tensor) + smooth_ln_fcs, all in Pallas kernels."""
    x = params["embed"][input_ids.reshape(-1)]                  # [B*S, H]

    # act scales for q/k/v projections (input = output of input_layernorm)
    act1 = rmsnorm_absmax(x, params["ln1"])
    ln1_new, (wq, wk, wv) = smooth_ln_fcs(
        params["ln1"], [params["wq"], params["wk"], params["wv"]], act1)

    # act scales for gate/up projections (input = output of post_attention_layernorm)
    # TODO(synk): real flow hooks the post-attention activations; we reuse the
    # embedding stream as the calibration signal for this synthetic model.
    act2 = rmsnorm_absmax(x, params["ln2"])
    ln2_new, (wg, wu) = smooth_ln_fcs(
        params["ln2"], [params["wg"], params["wu"]], act2)

    p = dict(params)
    p.update(ln1=ln1_new, wq=wq, wk=wk, wv=wv, ln2=ln2_new, wg=wg, wu=wu)
    return p


def prepare_runtime_params(params):
    """Fuse q/k/v and gate/up, pre-transpose weights to [in,out], cast to bf16 (once)."""
    t = lambda w: jnp.transpose(w).astype(jnp.bfloat16)
    return {
        "embed": params["embed"],
        "ln1": params["ln1"], "ln2": params["ln2"], "lnf": params["lnf"],
        "wqkv_t": t(jnp.concatenate([params["wq"], params["wk"], params["wv"]], 0)),
        "wo_t": t(params["wo"]),
        "wgu_t": t(jnp.concatenate([params["wg"], params["wu"]], 0)),
        "wd_t": t(params["wd"]),
        "lm_head_t": t(params["lm_head"]),
    }


def llama_forward(params, input_ids, n_heads, head_dim):
    """forward(): delegates to the wrapped (tiny LLaMA-style) causal LM."""
    B, S = input_ids.shape
    H = params["embed"].shape[1]
    V = params["lm_head_t"].shape[1]
    I = params["wgu_t"].shape[1] // 2

    h = params["embed"][input_ids.reshape(-1)]                  # [B*S, H] (gather in JAX)
    cos, sin = rope_tables(S, head_dim)                         # [S, D]
    cos_tok = jnp.tile(cos, (B, 1))                             # [B*S, D] per-token
    sin_tok = jnp.tile(sin, (B, 1))

    # attention block: fused rmsnorm + QKV matmul (+ RoPE epilogue on q|k, bf16 out)
    # -> flash attention (lower-tri KV schedule) -> wo + residual (f32)
    qkv = rmsnorm_matmul(h, params["ln1"], params["wqkv_t"],
                         out_dtype=jnp.bfloat16,
                         rope_cos=cos_tok, rope_sin=sin_tok,
                         head_dim=head_dim, rope_cols=2 * H)    # [B*S, 3H] bf16
    attn = flash_attention(qkv, batch=B, seq=S,
                           n_heads=n_heads, head_dim=head_dim)  # [B*S, H] bf16
    h = matmul_residual(attn, params["wo_t"], h)                # [B*S, H] f32

    # MLP block: fused rmsnorm + gate/up (bf16 out) -> fused SiLU*up + down + residual
    gu = rmsnorm_matmul(h, params["ln2"], params["wgu_t"],
                        out_dtype=jnp.bfloat16)                 # [B*S, 2I] bf16
    h = silu_mul_matmul_residual(gu, params["wd_t"], h, I)      # [B*S, H] f32

    # head: fused final rmsnorm + lm_head (logits stay f32)
    logits = rmsnorm_matmul(h, params["lnf"], params["lm_head_t"])  # [B*S, V]
    return logits.reshape(B, S, V)


if __name__ == "__main__":
    # small llama-like config
    B, S = 2, 8          # batch, sequence
    V, H = 256, 128      # vocab, hidden
    Hn, D = 4, 32        # heads, head_dim
    I = 256              # intermediate size

    key = jax.random.PRNGKey(0)
    k_param, k_ids = jax.random.split(key)
    params = init_params(k_param, V, H, Hn, D, I)
    input_ids = jax.random.randint(k_ids, (B, S), 0, V, dtype=jnp.int32)

    # SmoothQuant preprocessing (get_act_scales + smooth_ln_fcs), all in Pallas kernels.
    smoothed = smooth_model(params, input_ids)
    runtime = prepare_runtime_params(smoothed)     # fuse QKV/gate-up, pre-transpose, bf16

    # forward() == self.model(input_ids)
    logits = llama_forward(runtime, input_ids, Hn, D)
    jax.block_until_ready(logits)

    assert logits.shape == (B, S, V)
    assert bool(jnp.isfinite(logits).all())
    print("KERNEL_OK")
</pallas_src>

<mosaic_0001>
module attributes {stable_mosaic.version = 11 : i64} {
  func.func @_rmsnorm_absmax_kernel(%arg0: i32, %arg1: memref<16x128xf32, #tpu.memory_space<vmem>>, %arg2: memref<1x128xf32, #tpu.memory_space<vmem>>, %arg3: memref<1x128xf32, #tpu.memory_space<vmem>>) attributes {dimension_semantics = [#tpu.dimension_semantics<arbitrary>], iteration_bounds = array<i64: 1>, scalar_prefetch = 0 : i64, scratch_operands = 0 : i64, tpu.core_type = #tpu.core_type<tc>, window_params = [{transform_indices = @transform_0, window_bounds = array<i64: 16, 128>}, {pipeline_mode = #tpu.pipeline_mode<synchronous>, transform_indices = @transform_1, window_bounds = array<i64: 1, 128>}, {pipeline_mode = #tpu.pipeline_mode<synchronous>, transform_indices = @transform_2, window_bounds = array<i64: 1, 128>}]} {
    %c0 = arith.constant 0 : index
    %c0_0 = arith.constant 0 : index
    %0 = vector.load %arg1[%c0, %c0_0] : memref<16x128xf32, #tpu.memory_space<vmem>>, vector<16x128xf32>
    %1 = arith.mulf %0, %0 : vector<16x128xf32>
    %cst = arith.constant dense<0.000000e+00> : vector<16xf32>
    %2 = vector.multi_reduction <add>, %1, %cst [1] : vector<16x128xf32> to vector<16xf32>
    %3 = vector.shape_cast %2 : vector<16xf32> to vector<16x1xf32>
    %cst_1 = arith.constant 7.812500e-03 : f32
    %4 = vector.broadcast %cst_1 : f32 to vector<16x1xf32>
    %5 = arith.mulf %3, %4 : vector<16x1xf32>
    %cst_2 = arith.constant 9.99999997E-7 : f32
    %6 = vector.broadcast %cst_2 : f32 to vector<16x1xf32>
    %7 = arith.addf %5, %6 : vector<16x1xf32>
    %8 = math.rsqrt %7 : vector<16x1xf32>
    %9 = vector.broadcast %8 : vector<16x1xf32> to vector<16x128xf32>
    %10 = arith.mulf %0, %9 : vector<16x128xf32>
    %c0_3 = arith.constant 0 : index
    %c0_4 = arith.constant 0 : index
    %11 = vector.load %arg2[%c0_3, %c0_4] : memref<1x128xf32, #tpu.memory_space<vmem>>, vector<1x128xf32>
    %12 = vector.broadcast %11 : vector<1x128xf32> to vector<16x128xf32>
    %13 = arith.mulf %10, %12 : vector<16x128xf32>
    %14 = math.absf %13 : vector<16x128xf32>
    %cst_5 = arith.constant dense<0xFF800000> : vector<128xf32>
    %15 = vector.multi_reduction <maximumf>, %14, %cst_5 [0] : vector<16x128xf32> to vector<128xf32>
    %16 = vector.shape_cast %15 : vector<128xf32> to vector<1x128xf32>
    %c0_i32 = arith.constant 0 : i32
    %17 = arith.cmpi eq, %arg0, %c0_i32 : i32
    %18 = arith.extui %17 : i1 to i32
    %c0_i32_6 = arith.constant 0 : i32
    %19 = arith.cmpi ne, %18, %c0_i32_6 : i32
    scf.if %19 {
      %c0_9 = arith.constant 0 : index
      %c0_10 = arith.constant 0 : index
      %23 = vector.load %arg3[%c0_9, %c0_10] : memref<1x128xf32, #tpu.memory_space<vmem>>, vector<1x128xf32>
      tpu.vector_store %arg3[%c0_9, %c0_10], %16 {strides = array<i32>} : memref<1x128xf32, #tpu.memory_space<vmem>>, vector<1x128xf32>,
    } else {
    }
    %c0_i32_7 = arith.constant 0 : i32
    %20 = arith.cmpi ne, %arg0, %c0_i32_7 : i32
    %21 = arith.extui %20 : i1 to i32
    %c0_i32_8 = arith.constant 0 : i32
    %22 = arith.cmpi ne, %21, %c0_i32_8 : i32
    scf.if %22 {
      %c0_9 = arith.constant 0 : index
      %c0_10 = arith.constant 0 : index
      %23 = vector.load %arg3[%c0_9, %c0_10] : memref<1x128xf32, #tpu.memory_space<vmem>>, vector<1x128xf32>
      %24 = arith.maximumf %23, %16 : vector<1x128xf32>
      %c0_11 = arith.constant 0 : index
      %c0_12 = arith.constant 0 : index
      %25 = vector.load %arg3[%c0_11, %c0_12] : memref<1x128xf32, #tpu.memory_space<vmem>>, vector<1x128xf32>
      tpu.vector_store %arg3[%c0_11, %c0_12], %24 {strides = array<i32>} : memref<1x128xf32, #tpu.memory_space<vmem>>, vector<1x128xf32>,
    } else {
    }
    return
  }
  func.func @transform_0(%arg0: i32) -> (i32, i32) {
    %c0_i32 = arith.constant 0 : i32
    %c0_i32_0 = arith.constant 0 : i32
    return %arg0, %c0_i32 : i32, i32
  }
  func.func @transform_1(%arg0: i32) -> (i32, i32) {
    %c0_i32 = arith.constant 0 : i32
    %c0_i32_0 = arith.constant 0 : i32
    %c0_i32_1 = arith.constant 0 : i32
    return %c0_i32, %c0_i32_0 : i32, i32
  }
  func.func @transform_2(%arg0: i32) -> (i32, i32) {
    %c0_i32 = arith.constant 0 : i32
    %c0_i32_0 = arith.constant 0 : i32
    %c0_i32_1 = arith.constant 0 : i32
    return %c0_i32, %c0_i32_0 : i32, i32
  }
}

</mosaic_0001>

<bundles_post_ra>
// kernel: tpu_custom_call.1
= control target key start
LH: loop header
LB: loop body
LE: loop exit
PB: predicated region body
PF: predicated region fallthrough
CT: control target
= control target key end

     0   :  { %7 = vsyncpa [#allocation3], 0  ;;  %s190_s0 = inlined_call_operand.hbm [shape: f32[16,128], index: 0, kind: input, shape index: {}]   ;;  %s191_s1 = inlined_call_operand.vmem [shape: f32[1,128], index: 1, kind: input, shape index: {}]   ;;  %s192_s2 = inlined_call_operand.hbm [shape: f32[1,128], index: 2, kind: output, shape index: {}]  }
   0x1   :  { %8 = vsyncpa [#allocation4], 0  ;;  %s144_s9 = smov [#allocation2]   ;;  %s96_s13 = scalar_lea.hbm %s190_s0, 256 }
   0x2   :  { %s14_s10 = sshll.u32 %s144_s9, 4  ;;  %p97_p0 = scmp.ne.s32.totalorder %s190_s0, %s96_s13  ;;  %s15_s10 = int_to_ptr.vmem [resolvable:$true] %s14_s10 }
   0x3   :  { %p100_p1 = scmp.lt.u32.totalorder %s96_s13, %s190_s0 }
   0x5   :  { %p102_p2 = pnand %p100_p1, %p97_p0 }
   0x7   :  { %105 = shalt.err (!%p102_p2)
}
   0x8   :  { %s106_s18 = scalar_lea.vmem %s15_s10, 256  ;;  %p111_p4 = scmp.lt.s32.totalorder %s15_s10, %s15_s10 }
   0x9   :  { %p107_p3 = scmp.ne.s32.totalorder %s15_s10, %s106_s18  ;;  %p112_p5 = scmp.lt.s32.totalorder %s106_s18, %s106_s18 }
   0xb   :  { %p113_p6 = por %p112_p5, %p111_p4 }
   0xd   :  { %p114_p7 = pnand %p113_p6, %p107_p3 }
   0xf   :  { %117 = shalt.err (!%p114_p7)
}
  0x10   :  { %s145_s19 = smov 128   ;;  %s146_s20 = smov 8  }
  0x11   :  { %20 = dma.hbm_to_vmem [thread:$0]  %s190_s0, 256, %s15_s10, [#allocation3], %s145_s19, %s145_s19, %s146_s20  }
  0x12   :  { %140 = dma.done.wait [#allocation3], 256  }
  0x13   :  { %141 = vsyncadd [#allocation3], 4294967040  ;;  %v26_v0 = vld [vmem:[#allocation2] sm:$0xff]  ;;  %v27_v1 = vld [vmem:[#allocation2 + $0x8] sm:$0xff]  ;;  %s147_s24 = smov [#allocation5]  }
  0x14   :  { %v28_v2 = vmul.f32 %v26_v0, %v26_v0  ;;  %v29_v3 = vmul.f32 %v27_v1, %v27_v1  ;;  %v87_v12 = vld [vmem:[%s191_s1] ss:$0 sm:$0xff]  ;;  %s78_s25 = sshll.u32 %s147_s24, 4  ;;  %s79_s25 = int_to_ptr.vmem [resolvable:$true] %s78_s25 }
  0x15   :  { %s118_s26 = scalar_lea.vmem %s79_s25, 16  ;;  %s122_s1 = scalar_lea.vmem %s79_s25, 32 }
  0x16   :  { %30 = vadd.xlane.f32.xlu0 %v28_v2  ;;  %p119_p8 = scmp.ne.s32.totalorder %s79_s25, %s118_s26  ;;  %p123_p9 = scmp.lt.s32.totalorder %s79_s25, %s79_s25 }
  0x17   :  { %p124_p10 = scmp.lt.s32.totalorder %s122_s1, %s118_s26 }
  0x19   :  { %p125_p11 = por %p124_p10, %p123_p9 }
  0x1a   :  { %32 = vadd.xlane.f32.xlu0 %v29_v3 }
  0x1b   :  { %p126_p12 = pnand %p125_p11, %p119_p8 }
  0xa3   :  { %v31_v4 = vpop.xlane.xlu0 %30 }
  0xa4   :  { %v34_v5 = vmul.f32 0.0078125, %v31_v4 }
  0xa6   :  { %v36_v6 = vadd.f32 1e-06, %v34_v5 }
  0xa7   :  { %v33_v7 = vpop.xlane.xlu0 %32 }
  0xa8   :  { %92 = vrsqrt.f32 %v36_v6  ;;  %v35_v8 = vmul.f32 0.0078125, %v33_v7 }
  0xaa   :  { %v37_v9 = vadd.f32 1e-06, %v35_v8 }
  0xac   :  { %94 = vrsqrt.f32 %v37_v9 }
  0xb2   :  { %v93_v10 = vpop.eup %92 }
  0xb3   :  { %v40_v11 = vmul.f32 %v93_v10, %v26_v0 }
  0xb5   :  { %v49_v15 = vmul.f32 %v87_v12, %v40_v11 }
  0xb6   :  { %v95_v13 = vpop.eup %94 }
  0xb7   :  { %v41_v14 = vmul.f32 %v95_v13, %v27_v1  ;;  %v51_v17 = vand.u32 2147483647, %v49_v15 }
  0xb9   :  { %v50_v16 = vmul.f32 %v87_v12, %v41_v14 }
  0xbb   :  { %v52_v18 = vand.u32 2147483647, %v50_v16 }
  0xbd   :  { %v53_v19 = vmax.f32.f32 %v51_v17, %v52_v18 }
  0xbf   :  { %v54_v20 = vrot.slane %v53_v19, 4 }
  0xc1   :  { %v55_v21 = vmax.f32 %v53_v19, %v54_v20 }
  0xc3   :  { %v56_v22 = vrot.slane %v55_v21, 2 }
  0xc5   :  { %v57_v23 = vmax.f32 %v55_v21, %v56_v22 }
  0xc7   :  { %v58_v24 = vrot.slane %v57_v23, 1 }
  0xc9   :  { %v59_v25 = vmax.f32 %v57_v23, %v58_v24 }
  0xcb   :  { %64 = vst [vmem:[#allocation5] sm:$0x1] %v59_v25 }
  0xcc   :  { %129 = shalt.err (!%p126_p12)
}
  0xcd   :  { %s130_s29 = scalar_lea.hbm %s192_s2, 16 }
  0xce   :  { %p131_p13 = scmp.ne.s32.totalorder %s192_s2, %s130_s29  ;;  %p134_p0 = scmp.lt.u32.totalorder %s130_s29, %s192_s2 }
  0xd0   :  { %p136_p1 = pnand %p134_p0, %p131_p13 }
  0xd2   :  { %139 = shalt.err (!%p136_p1)
}
  0xd3   :  { %81 = dma.vmem_to_hbm [thread:$0]  %s79_s25, 16, %s192_s2, [#allocation4]  }
  0xd4   :  { %142 = dma.done.wait [#allocation4], 16  }
  0xd5   :  { %143 = vsyncadd [#allocation4], 4294967280 }
  0xd6   :  { %85 = vsyncpa [#allocation3], 1 }
  0xd7   :  { %86 = vsyncpa [#allocation4], 1 }

</bundles_post_ra>
